<compile_context>
chip_gen: v7x
topology: tpu7x:2x2x1
jax: 0.10.0
libtpu: 0.0.40
codegen_flags: <defaults>
</compile_context>

<pallas_src>
import math

import jax
import jax.numpy as jnp
from jax.experimental import pallas as pl
from jax.experimental.pallas import tpu as pltpu

# ---------------- model hyper-parameters (small, consistent with forward) ----
BATCH   = 2
SEQ     = 8
D_MODEL = 32
N_HEADS = 4
D_HEAD  = D_MODEL // N_HEADS


def _mha_kernel(x_ref, w_qkv_ref, b_qkv_ref, w_out_ref, b_out_ref,
                head_mask_ref, attn_bias_ref, gather_ref, o_ref):
    """Single-invocation MHA; x_ref is (B*S, D) — batch folded into rows."""
    D = D_MODEL

    x = x_ref[...]                                                    # (BS, D) f32

    # Fused Q/K/V projection: weights pre-transposed to (D, 3D); the
    # 1/sqrt(d_head) scale is already folded into the Q columns/bias.
    qkv = (jnp.dot(x, w_qkv_ref[...], preferred_element_type=jnp.float32)
           + b_qkv_ref[...])                                          # (BS, 3D)
    q = qkv[:, 0 * D:1 * D]                                           # (BS, D), pre-scaled
    k = qkv[:, 1 * D:2 * D]
    v = qkv[:, 2 * D:3 * D]

    head_mask = head_mask_ref[...]                                    # (H*BS, D)

    # All heads in one contraction: stack head-masked copies of Q along the
    # sublane axis; row block h of `s` is head h's (BS, BS) score matrix.
    q_heads = jnp.concatenate([q] * N_HEADS, axis=0) * head_mask      # (H*BS, D)
    s = jnp.einsum('nd,md->nm', q_heads, k,
                   preferred_element_type=jnp.float32)                # (H*BS, BS)
    s = s + attn_bias_ref[...]          # -1e30 on cross-batch (i, j) pairs

    # Numerically-stable softmax over the key axis (matches F.softmax(dim=-1)).
    s = s - jnp.max(s, axis=-1, keepdims=True)
    p = jnp.exp(s)
    # approx=True would move the normalize to the EUP, but its error exceeds
    # the 1e-4 f32 validation tolerance used below; keep the exact reciprocal.
    p = p * pl.reciprocal(jnp.sum(p, axis=-1, keepdims=True))
    # TODO(synk): nn.Dropout(p=0.1) on attention weights is stochastic in train
    # mode; implemented here as inference-mode identity.

    # Per-head context blocks, then gather the head-diagonal blocks back into a
    # single lane-dense (BS, D) slab via a tiny constant matmul.
    ctx_blocks = (jnp.dot(p, v, preferred_element_type=jnp.float32)
                  * head_mask)                                        # (H*BS, D)
    ctx = jnp.dot(gather_ref[...], ctx_blocks,
                  preferred_element_type=jnp.float32)                 # (BS, D)

    out = (jnp.dot(ctx, w_out_ref[...], preferred_element_type=jnp.float32)
           + b_out_ref[...])
    o_ref[...] = out.astype(o_ref.dtype)


def multi_head_attention(x, params, edge_index=None):
    """x: (B, S, D) float32.  edge_index is accepted but unused (as in PyTorch)."""
    del edge_index
    B, S, D = x.shape
    BS = B * S
    H, Dh = N_HEADS, D_HEAD
    wq, bq, wk, bk, wv, bv, wo, bo = params
    scale = 1.0 / math.sqrt(Dh)

    # Host-side layout plumbing (done once at init in a real model):
    # pre-transpose to (in, out), fuse Q/K/V, fold the attention scale into Q.
    w_qkv = jnp.concatenate([wq.T * scale, wk.T, wv.T], axis=1)       # (D, 3D)
    b_qkv = jnp.concatenate([bq * scale, bk, bv], axis=1)             # (1, 3D)
    w_out = wo.T                                                      # (D, D)

    # Static helper operands.
    # head_mask[h*BS + i, d] = 1 iff feature d belongs to head h.
    row_head = jax.lax.broadcasted_iota(jnp.int32, (H * BS, D), 0) // BS
    col_head = jax.lax.broadcasted_iota(jnp.int32, (H * BS, D), 1) // Dh
    head_mask = (row_head == col_head).astype(jnp.float32)            # (H*BS, D)

    # attn_bias[h*BS + i, j] = 0 if tokens i and j belong to the same batch
    # element, else -1e30 (batch is folded into the token index).
    row_tok = jax.lax.broadcasted_iota(jnp.int32, (H * BS, BS), 0) % BS
    col_tok = jax.lax.broadcasted_iota(jnp.int32, (H * BS, BS), 1)
    attn_bias = jnp.where((row_tok // S) == (col_tok // S),
                          0.0, -1e30).astype(jnp.float32)             # (H*BS, BS)

    # gather[i, h*BS + j] = 1 iff j == i  (sums the head-diagonal blocks).
    gather = jnp.tile(jnp.eye(BS, dtype=jnp.float32), (1, H))         # (BS, H*BS)

    x2 = x.reshape(BS, D)

    vmem = pl.BlockSpec(memory_space=pltpu.MemorySpace.VMEM)
    out2 = pl.pallas_call(
        _mha_kernel,
        out_shape=jax.ShapeDtypeStruct((BS, D), x.dtype),
        in_specs=[vmem] * 8,
        out_specs=vmem,
    )(x2, w_qkv, b_qkv, w_out, bo, head_mask, attn_bias, gather)
    return out2.reshape(B, S, D)


def _reference(x, params):
    """Pure-JAX reference mirroring the PyTorch forward (eval mode)."""
    wq, bq, wk, bk, wv, bv, wo, bo = params
    B, S, D = x.shape

    def lin(a, w, b):
        return a @ w.T + b[0]

    q = lin(x, wq, bq).reshape(B, S, N_HEADS, D_HEAD).transpose(0, 2, 1, 3)
    k = lin(x, wk, bk).reshape(B, S, N_HEADS, D_HEAD).transpose(0, 2, 1, 3)
    v = lin(x, wv, bv).reshape(B, S, N_HEADS, D_HEAD).transpose(0, 2, 1, 3)
    s = jnp.einsum('bhqd,bhkd->bhqk', q, k) / math.sqrt(D_HEAD)
    p = jax.nn.softmax(s, axis=-1)
    ctx = jnp.einsum('bhqk,bhkd->bhqd', p, v)
    ctx = ctx.transpose(0, 2, 1, 3).reshape(B, S, D)
    return lin(ctx, wo, bo)


def init_params(key):
    """Deterministic parameter init (PyTorch-Linear-like uniform)."""
    keys = jax.random.split(key, 8)
    bound = 1.0 / math.sqrt(D_MODEL)

    def w(k):
        return jax.random.uniform(k, (D_MODEL, D_MODEL), jnp.float32, -bound, bound)

    def b(k):
        return jax.random.uniform(k, (1, D_MODEL), jnp.float32, -bound, bound)

    return (w(keys[0]), b(keys[1]),   # q_linear
            w(keys[2]), b(keys[3]),   # k_linear
            w(keys[4]), b(keys[5]),   # v_linear
            w(keys[6]), b(keys[7]))   # out_linear


if __name__ == "__main__":
    key = jax.random.PRNGKey(0)
    kx, kp = jax.random.split(key)
    x = jax.random.normal(kx, (BATCH, SEQ, D_MODEL), jnp.float32)
    edge_index = jnp.zeros((2, 4), jnp.int32)   # accepted but unused, as in PyTorch
    params = init_params(kp)

    out = multi_head_attention(x, params, edge_index)
    out = jax.block_until_ready(out)

    ref = _reference(x, params)
    assert out.shape == (BATCH, SEQ, D_MODEL)
    assert jnp.allclose(out, ref, atol=1e-4, rtol=1e-4), "mismatch vs JAX reference"
    print("KERNEL_OK")
</pallas_src>

<mosaic_0001>
module attributes {stable_mosaic.version = 11 : i64} {
  func.func @_mha_kernel(%arg0: memref<16x32xf32, #tpu.memory_space<vmem>>, %arg1: memref<32x96xf32, #tpu.memory_space<vmem>>, %arg2: memref<1x96xf32, #tpu.memory_space<vmem>>, %arg3: memref<32x32xf32, #tpu.memory_space<vmem>>, %arg4: memref<1x32xf32, #tpu.memory_space<vmem>>, %arg5: memref<64x32xf32, #tpu.memory_space<vmem>>, %arg6: memref<64x16xf32, #tpu.memory_space<vmem>>, %arg7: memref<16x64xf32, #tpu.memory_space<vmem>>, %arg8: memref<16x32xf32, #tpu.memory_space<vmem>>) attributes {dimension_semantics = [], scalar_prefetch = 0 : i64, scratch_operands = 0 : i64, tpu.core_type = #tpu.core_type<tc>} {
    %c0 = arith.constant 0 : index
    %c0_0 = arith.constant 0 : index
    %0 = vector.load %arg0[%c0, %c0_0] : memref<16x32xf32, #tpu.memory_space<vmem>>, vector<16x32xf32>
    %c0_1 = arith.constant 0 : index
    %c0_2 = arith.constant 0 : index
    %1 = vector.load %arg1[%c0_1, %c0_2] : memref<32x96xf32, #tpu.memory_space<vmem>>, vector<32x96xf32>
    %cst = arith.constant dense<0.000000e+00> : vector<16x96xf32>
    %2 = tpu.matmul %0, %1, %cst {dimension_numbers = #tpu.dot_dimension_numbers<[1], [0], [0], [1], [0, 0, 1, 1], [], []>} : vector<16x32xf32>, vector<32x96xf32>, vector<16x96xf32> -> vector<16x96xf32>
    %c0_3 = arith.constant 0 : index
    %c0_4 = arith.constant 0 : index
    %3 = vector.load %arg2[%c0_3, %c0_4] : memref<1x96xf32, #tpu.memory_space<vmem>>, vector<1x96xf32>
    %4 = vector.broadcast %3 : vector<1x96xf32> to vector<16x96xf32>
    %5 = arith.addf %2, %4 : vector<16x96xf32>
    %6 = vector.extract_strided_slice %5 {offsets = [0, 0], sizes = [16, 32], strides = [1, 1]} : vector<16x96xf32> to vector<16x32xf32>
    %7 = vector.extract_strided_slice %5 {offsets = [0, 32], sizes = [16, 32], strides = [1, 1]} : vector<16x96xf32> to vector<16x32xf32>
    %8 = vector.extract_strided_slice %5 {offsets = [0, 64], sizes = [16, 32], strides = [1, 1]} : vector<16x96xf32> to vector<16x32xf32>
    %c0_5 = arith.constant 0 : index
    %c0_6 = arith.constant 0 : index
    %9 = vector.load %arg5[%c0_5, %c0_6] : memref<64x32xf32, #tpu.memory_space<vmem>>, vector<64x32xf32>
    %10 = tpu.concatenate %6, %6, %6, %6 in 0 : vector<16x32xf32>, vector<16x32xf32>, vector<16x32xf32>, vector<16x32xf32> -> vector<64x32xf32>
    %11 = arith.mulf %10, %9 : vector<64x32xf32>
    "tpu.trace_start"() <{level = 10 : i32, message = "nd,md->nm"}> : () -> ()
    %cst_7 = arith.constant dense<0.000000e+00> : vector<64x16xf32>
    %12 = tpu.matmul %11, %7, %cst_7 {dimension_numbers = #tpu.dot_dimension_numbers<[1], [1], [0], [0], [0, 0, 1, 0], [], []>} : vector<64x32xf32>, vector<16x32xf32>, vector<64x16xf32> -> vector<64x16xf32>
    "tpu.trace_stop"() : () -> ()
    %c0_8 = arith.constant 0 : index
    %c0_9 = arith.constant 0 : index
    %13 = vector.load %arg6[%c0_8, %c0_9] : memref<64x16xf32, #tpu.memory_space<vmem>>, vector<64x16xf32>
    %14 = arith.addf %12, %13 : vector<64x16xf32>
    %cst_10 = arith.constant dense<0xFF800000> : vector<64xf32>
    %15 = vector.multi_reduction <maximumf>, %14, %cst_10 [1] : vector<64x16xf32> to vector<64xf32>
    %16 = vector.shape_cast %15 : vector<64xf32> to vector<64x1xf32>
    %17 = vector.broadcast %16 : vector<64x1xf32> to vector<64x16xf32>
    %18 = arith.subf %14, %17 : vector<64x16xf32>
    %19 = math.exp %18 : vector<64x16xf32>
    %cst_11 = arith.constant dense<0.000000e+00> : vector<64xf32>
    %20 = vector.multi_reduction <add>, %19, %cst_11 [1] : vector<64x16xf32> to vector<64xf32>
    %21 = vector.shape_cast %20 : vector<64xf32> to vector<64x1xf32>
    %22 = tpu.reciprocal %21 : vector<64x1xf32> -> vector<64x1xf32>
    %23 = vector.broadcast %22 : vector<64x1xf32> to vector<64x16xf32>
    %24 = arith.mulf %19, %23 : vector<64x16xf32>
    %cst_12 = arith.constant dense<0.000000e+00> : vector<64x32xf32>
    %25 = tpu.matmul %24, %8, %cst_12 {dimension_numbers = #tpu.dot_dimension_numbers<[1], [0], [0], [1], [0, 0, 1, 1], [], []>} : vector<64x16xf32>, vector<16x32xf32>, vector<64x32xf32> -> vector<64x32xf32>
    %26 = arith.mulf %25, %9 : vector<64x32xf32>
    %c0_13 = arith.constant 0 : index
    %c0_14 = arith.constant 0 : index
    %27 = vector.load %arg7[%c0_13, %c0_14] : memref<16x64xf32, #tpu.memory_space<vmem>>, vector<16x64xf32>
    %cst_15 = arith.constant dense<0.000000e+00> : vector<16x32xf32>
    %28 = tpu.matmul %27, %26, %cst_15 {dimension_numbers = #tpu.dot_dimension_numbers<[1], [0], [0], [1], [0, 0, 1, 1], [], []>} : vector<16x64xf32>, vector<64x32xf32>, vector<16x32xf32> -> vector<16x32xf32>
    %c0_16 = arith.constant 0 : index
    %c0_17 = arith.constant 0 : index
    %29 = vector.load %arg3[%c0_16, %c0_17] : memref<32x32xf32, #tpu.memory_space<vmem>>, vector<32x32xf32>
    %cst_18 = arith.constant dense<0.000000e+00> : vector<16x32xf32>
    %30 = tpu.matmul %28, %29, %cst_18 {dimension_numbers = #tpu.dot_dimension_numbers<[1], [0], [0], [1], [0, 0, 1, 1], [], []>} : vector<16x32xf32>, vector<32x32xf32>, vector<16x32xf32> -> vector<16x32xf32>
    %c0_19 = arith.constant 0 : index
    %c0_20 = arith.constant 0 : index
    %31 = vector.load %arg4[%c0_19, %c0_20] : memref<1x32xf32, #tpu.memory_space<vmem>>, vector<1x32xf32>
    %32 = vector.broadcast %31 : vector<1x32xf32> to vector<16x32xf32>
    %33 = arith.addf %30, %32 : vector<16x32xf32>
    %c0_21 = arith.constant 0 : index
    %c0_22 = arith.constant 0 : index
    %34 = vector.load %arg8[%c0_21, %c0_22] : memref<16x32xf32, #tpu.memory_space<vmem>>, vector<16x32xf32>
    tpu.vector_store %arg8[%c0_21, %c0_22], %33 {strides = array<i32>} : memref<16x32xf32, #tpu.memory_space<vmem>>, vector<16x32xf32>,
    return
  }
}

</mosaic_0001>

<bundles_post_ra>
// kernel: tpu_custom_call.1
= control target key start
LH: loop header
LB: loop body
LE: loop exit
PB: predicated region body
PF: predicated region fallthrough
CT: control target
= control target key end

     0   :  { %vm43_vm0 = vcmask 261120   ;;  %s1198_s0 = inlined_call_operand.vmem [shape: f32[16,32], index: 0, kind: input, shape index: {}]   ;;  %s1199_s1 = inlined_call_operand.vmem [shape: f32[32,96], index: 1, kind: input, shape index: {}]   ;;  %s1200_s2 = inlined_call_operand.vmem [shape: f32[1,96], index: 2, kind: input, shape index: {}]   ;;  %s1201_s3 = inlined_call_operand.vmem [shape: f32[32,32], index: 3, kind: input, shape index: {}]   ;;  %s1202_s4 = inlined_call_operand.vmem [shape: f32[1,32], index: 4, kind: input, shape index: {}]   ;;  %s1203_s5 = inlined_call_operand.vmem [shape: f32[64,32], index: 5, kind: input, shape index: {}]   ;;  %s1204_s6 = inlined_call_operand.vmem [shape: f32[64,16], index: 6, kind: input, shape index: {}]   ;;  %s1205_s7 = inlined_call_operand.vmem [shape: f32[16,64], index: 7, kind: input, shape index: {}]   ;;  %s1206_s8 = inlined_call_operand.hbm [shape: f32[16,32], index: 8, kind: output, shape index: {}]  }
   0x1   :  { %v32_v0 = vld [vmem:[%s1199_s1] sm:$0xff]  ;;  %v33_v1 = vld [vmem:[%s1199_s1 + $0x8] sm:$0xff]  ;;  %v34_v2 = vld [vmem:[%s1199_s1 + $0x10] sm:$0xff] }
   0x2   :  { %v855_v3 = vpack.c.bf16 %v33_v1, %v32_v0  ;;  %v35_v4 = vld [vmem:[%s1199_s1 + $0x18] sm:$0xff]  ;;  %v30_v5 = vld [vmem:[%s1198_s0] sm:$0xff] }
   0x3   :  { %v859_v6 = vpack.c.bf16 %v35_v4, %v34_v2  ;;  %790 = vmatprep.mubr.msk.f32.mxu0 %vm43_vm0, %v30_v5 }
   0x4   :  { %13 = vsyncpa [#allocation3], 0  ;;  %856 = vmatprep.subr.bf16.mxu0 %v855_v3  ;;  %v31_v7 = vld [vmem:[%s1198_s0 + $0x8] sm:$0xff]  ;;  %v714_v8 = vld [vmem:[%s1200_s2] ss:$0 sm:$0xff]  ;;  %s968_s0 = smov 96  }
   0x5   :  { %858 = vmatpush3.bf16.msra.mxu0 %v855_v3  ;;  %v1044_v12 = vld [vmem:[%s1203_s5] sm:$0xff]  ;;  %vm864_vm1 = vmpackc.low %vm43_vm0, %vm43_vm0  ;;  %v1056_v20 = vld [vmem:[%s1203_s5 + $0x8] sm:$0xff]  ;;  %vm288_vm2 = vcmask 130048   ;;  %vm522_vm3 = vcmask 523264   ;;  %s970_s14 = smov [#allocation2]  }
   0x6   :  { %860 = vmatprep.subr.bf16.mxu0 %v859_v6  ;;  %v1061_v21 = vld [vmem:[%s1203_s5 + $0x10] sm:$0xff]  ;;  %v1068_v24 = vld [vmem:[%s1203_s5 + $0x18] sm:$0xff]  ;;  %v1074_v25 = vld [vmem:[%s1203_s5 + $0x20] sm:$0xff] }
   0x7   :  { %v1082_v28 = vld [vmem:[%s1203_s5 + $0x28] sm:$0xff]  ;;  %v1088_v29 = vld [vmem:[%s1203_s5 + $0x30] sm:$0xff]  ;;  %v1096_v32 = vld [vmem:[%s1203_s5 + $0x38] sm:$0xff]  ;;  %s703_s5 = sshll.u32 %s970_s14, 4  ;;  %s704_s5 = int_to_ptr.vmem [resolvable:$true] %s703_s5 }
   0x8   :  { %v142_v34 = vld [vmem:[%s1204_s6 + $0x8] sm:$0xff]  ;;  %v141_v35 = vld [vmem:[%s1204_s6] sm:$0xff]  ;;  %v144_v40 = vld [vmem:[%s1204_s6 + $0x18] sm:$0xff]  ;;  %p949_p1 = scmp.lt.s32.totalorder %s704_s5, %s704_s5 }
   0x9   :  { %862 = vmatpush3.bf16.msra.mxu0 %v859_v6  ;;  %v143_v43 = vld [vmem:[%s1204_s6 + $0x10] sm:$0xff]  ;;  %v146_v49 = vld [vmem:[%s1204_s6 + $0x28] sm:$0xff]  ;;  %v145_v54 = vld [vmem:[%s1204_s6 + $0x20] sm:$0xff] }
   0xa   :  { %v147_v59 = vld [vmem:[%s1204_s6 + $0x30] sm:$0xff]  ;;  %v148_v62 = vld [vmem:[%s1204_s6 + $0x38] sm:$0xff]  ;;  %s969_s6 = smov 64  }
   0xc   :  { %791 = vmatmul.mubr.msk.f32.vlgmr.msra.gmra.mrb[0].mxu0 %vm43_vm0, %v31_v7 }
  0xdf   :  { %v792_v9 = vpop.f32.mrb[0].mxu0 }
  0xe0   :  { %v122_v10 = vadd.f32 %v792_v9, %v714_v8  ;;  %v116_v11 = vpop.f32.mrb[1].mxu0 }
  0xe1   :  { %v117_v13 = vadd.f32 %v714_v8, %v116_v11 }
  0xe2   :  { %v134_v22 = vmul.f32 %v1056_v20, %v122_v10  ;;  %v136_v26 = vmul.f32 %v1068_v24, %v122_v10  ;;  %v138_v30 = vmul.f32 %v1082_v28, %v122_v10  ;;  %v140_v33 = vmul.f32 %v1096_v32, %v122_v10 }
  0xe3   :  { %v1046_v14 = vpack.i.bf16 %v122_v10, %v117_v13  ;;  %v133_v15 = vmul.f32 %v1044_v12, %v117_v13  ;;  %v135_v23 = vmul.f32 %v1061_v21, %v117_v13  ;;  %v137_v27 = vmul.f32 %v1074_v25, %v117_v13 }
  0xe4   :  { %v139_v31 = vmul.f32 %v1088_v29, %v117_v13 }
  0xe5   :  { %903 = vrot.lane.b32.xlu0 %v1046_v14, %s968_s0  ;;  %797 = vmatprep.mubr.msk.f32.mxu1 %vm43_vm0, %v133_v15 }
 0x157   :  { %v904_v16 = vpop.permute.xlu0 %903 }
 0x158   :  { %v906_v17 = vunpack.i.h.bf16 %v904_v16  ;;  %v905_v18 = vunpack.i.l.bf16 %v904_v16 }
 0x15a   :  { %v863_v19 = vpack.c.bf16 %v906_v17, %v905_v18 }
 0x15c   :  { %865 = vmatprep.subr.msk.bf16.mxu1 %vm864_vm1, %v863_v19 }
 0x15d   :  { %868 = vmatpush3.bf16.xpose.msk.msra.mxu1 %vm864_vm1, %v863_v19 }
 0x164   :  { %798 = vmatmul.mubr.msk.f32.vlgmr.msra.gmra.mrb[0].mxu1 %vm43_vm0, %v134_v22 }
 0x165   :  { %800 = vmatprep.mubr.msk.f32.mxu1 %vm43_vm0, %v135_v23 }
 0x168   :  { %801 = vmatmul.mubr.msk.f32.gmra.mrb[2].mxu1 %vm43_vm0, %v136_v26 }
 0x169   :  { %803 = vmatprep.mubr.msk.f32.mxu1 %vm43_vm0, %v137_v27 }
 0x16c   :  { %804 = vmatmul.mubr.msk.f32.gmra.mrb[4].mxu1 %vm43_vm0, %v138_v30 }
 0x16d   :  { %806 = vmatprep.mubr.msk.f32.mxu1 %vm43_vm0, %v139_v31 }
 0x170   :  { %807 = vmatmul.mubr.msk.f32.gmra.mrb[6].mxu1 %vm43_vm0, %v140_v33 }
 0x237   :  { %v799_v36 = vpop.f32.mrb[0].mxu1 }
 0x238   :  { %v255_v37 = vadd.f32 %v799_v36, %v142_v34  ;;  %v249_v38 = vpop.f32.mrb[1].mxu1 }
 0x239   :  { %v250_v39 = vadd.f32 %v249_v38, %v141_v35 }
 0x23a   :  { %v292_v41 = vsel %vm288_vm2, %v255_v37, -inf }
 0x23b   :  { %293 = vmax.xlane.f32.xlu1 %v292_v41  ;;  %v802_v42 = vpop.f32.mrb[2].mxu1  ;;  %v289_v44 = vsel %vm288_vm2, %v250_v39, -inf }
 0x23c   :  { %v265_v45 = vadd.f32 %v802_v42, %v144_v40  ;;  %v259_v46 = vpop.f32.mrb[3].mxu1  ;;  %290 = vmax.xlane.f32.xlu0 %v289_v44 }
 0x23d   :  { %v260_v47 = vadd.f32 %v259_v46, %v143_v43 }
 0x23e   :  { %v298_v48 = vsel %vm288_vm2, %v265_v45, -inf }
 0x23f   :  { %299 = vmax.xlane.f32.xlu1 %v298_v48  ;;  %v805_v50 = vpop.f32.mrb[4].mxu1  ;;  %v295_v53 = vsel %vm288_vm2, %v260_v47, -inf }
 0x240   :  { %v269_v51 = vpop.f32.mrb[5].mxu1  ;;  %v275_v52 = vadd.f32 %v805_v50, %v146_v49 }
 0x241   :  { %v270_v57 = vadd.f32 %v269_v51, %v145_v54 }
 0x242   :  { %v304_v58 = vsel %vm288_vm2, %v275_v52, -inf }
 0x243   :  { %v808_v55 = vpop.f32.mrb[6].mxu1  ;;  %296 = vmax.xlane.f32.xlu1 %v295_v53  ;;  %v301_v61 = vsel %vm288_vm2, %v270_v57, -inf }
 0x244   :  { %v279_v56 = vpop.f32.mrb[7].mxu1  ;;  %v285_v63 = vadd.f32 %v808_v55, %v148_v62 }
 0x245   :  { %v280_v60 = vadd.f32 %v279_v56, %v147_v59 }
 0x246   :  { %v310_v1 = vsel %vm288_vm2, %v285_v63, -inf }
 0x247   :  { %305 = vmax.xlane.f32.xlu1 %v304_v58  ;;  %v307_v0 = vsel %vm288_vm2, %v280_v60, -inf }
 0x24b   :  { %302 = vmax.xlane.f32.xlu1 %v301_v61 }
 0x24f   :  { %308 = vmax.xlane.f32.xlu1 %v307_v0 }
 0x253   :  { %311 = vmax.xlane.f32.xlu1 %v310_v1 }
 0x2c8   :  { %v294_v2 = vpop.xlane.xlu1 %293 }
 0x2c9   :  { %v314_v3 = vsub.f32 %v255_v37, %v294_v2  ;;  %v291_v4 = vpop.xlane.xlu0 %290 }
 0x2ca   :  { %v313_v5 = vsub.f32 %v250_v39, %v291_v4 }
 0x2cb   :  { %v323_v6 = vmul.f32 1.442695, %v314_v3 }
 0x2cc   :  { %v321_v7 = vmul.f32 1.442695, %v313_v5  ;;  %v300_v8 = vpop.xlane.xlu1 %299 }
 0x2cd   :  { %v316_v9 = vsub.f32 %v265_v45, %v300_v8 }
 0x2ce   :  { %912 = vpow2.f32 %v321_v7 }
 0x2cf   :  { %914 = vpow2.f32 %v323_v6  ;;  %v327_v10 = vmul.f32 1.442695, %v316_v9 }
 0x2d0   :  { %v297_v11 = vpop.xlane.xlu1 %296 }
 0x2d1   :  { %v315_v13 = vsub.f32 %v260_v47, %v297_v11  ;;  %916 = vpow2.f32 %v327_v10 }
 0x2d3   :  { %v325_v15 = vmul.f32 1.442695, %v315_v13 }
 0x2d4   :  { %v306_v16 = vpop.xlane.xlu1 %305 }
 0x2d5   :  { %918 = vpow2.f32 %v325_v15  ;;  %v318_v17 = vsub.f32 %v275_v52, %v306_v16  ;;  %v520_v16 = vld [vmem:[%s1205_s7] sm:$0xff] }
 0x2d6   :  { %841 = vmatprep.mubr.msk.f32.mxu1 %vm522_vm3, %v520_v16 }
 0x2d7   :  { %v331_v18 = vmul.f32 1.442695, %v318_v17  ;;  %v604_v17 = vld [vmem:[%s1201_s3] sm:$0xff] }
 0x2d8   :  { %v913_v19 = vpop.eup %912  ;;  %v303_v22 = vpop.xlane.xlu1 %302 }
 0x2d9   :  { %920 = vpow2.f32 %v331_v18  ;;  %v317_v23 = vsub.f32 %v270_v57, %v303_v22  ;;  %v337_v26 = vsel %vm288_vm2, %v913_v19, 0.0  ;;  %v915_v27 = vpop.eup %914  ;;  %v605_v18 = vld [vmem:[%s1201_s3 + $0x8] sm:$0xff] }
 0x2da   :  { %338 = vadd.xlane.f32.xlu1 %v337_v26  ;;  %v340_v34 = vsel %vm288_vm2, %v915_v27, 0.0  ;;  %v889_v22 = vpack.c.bf16 %v605_v18, %v604_v17 }
 0x2db   :  { %v329_v30 = vmul.f32 1.442695, %v317_v23  ;;  %v917_v35 = vpop.eup %916  ;;  %v607_v23 = vld [vmem:[%s1201_s3 + $0x18] sm:$0xff] }
 0x2dc   :  { %v309_v31 = vpop.xlane.xlu1 %308  ;;  %v346_v41 = vsel %vm288_vm2, %v917_v35, 0.0 }
 0x2dd   :  { %922 = vpow2.f32 %v329_v30  ;;  %v319_v33 = vsub.f32 %v280_v60, %v309_v31 }
 0x2de   :  { %341 = vadd.xlane.f32.xlu1 %v340_v34 }
 0x2df   :  { %v919_v36 = vpop.eup %918  ;;  %v333_v37 = vmul.f32 1.442695, %v319_v33 }
 0x2e0   :  { %v312_v38 = vpop.xlane.xlu1 %311  ;;  %v343_v39 = vsel %vm288_vm2, %v919_v36, 0.0 }
 0x2e1   :  { %924 = vpow2.f32 %v333_v37  ;;  %v320_v40 = vsub.f32 %v285_v63, %v312_v38  ;;  %344 = vadd.xlane.f32.xlu0 %v343_v39 }
 0x2e2   :  { %347 = vadd.xlane.f32.xlu1 %v346_v41 }
 0x2e3   :  { %v921_v42 = vpop.eup %920  ;;  %v335_v43 = vmul.f32 1.442695, %v320_v40 }
 0x2e4   :  { %v352_v44 = vsel %vm288_vm2, %v921_v42, 0.0 }
 0x2e5   :  { %926 = vpow2.f32 %v335_v43 }
 0x2e6   :  { %353 = vadd.xlane.f32.xlu1 %v352_v44 }
 0x2e7   :  { %v923_v45 = vpop.eup %922 }
 0x2e8   :  { %v349_v46 = vsel %vm288_vm2, %v923_v45, 0.0 }
 0x2e9   :  { %350 = vadd.xlane.f32.xlu0 %v349_v46 }
 0x2eb   :  { %v925_v47 = vpop.eup %924 }
 0x2ec   :  { %v355_v48 = vsel %vm288_vm2, %v925_v47, 0.0 }
 0x2ed   :  { %356 = vadd.xlane.f32.xlu0 %v355_v48 }
 0x2ef   :  { %v927_v49 = vpop.eup %926 }
 0x2f0   :  { %v358_v50 = vsel %vm288_vm2, %v927_v49, 0.0 }
 0x2f1   :  { %359 = vadd.xlane.f32.xlu1 %v358_v50 }
 0x303   :  { %908 = vrot.lane.b32.xlu0 %v1046_v14, %s969_s6 }
 0x367   :  { %v339_v51 = vpop.xlane.xlu1 %338 }
 0x368   :  { %928 = vrcp.f32 %v339_v51 }
 0x36b   :  { %v342_v52 = vpop.xlane.xlu1 %341 }
 0x36c   :  { %930 = vrcp.f32 %v342_v52 }
 0x36e   :  { %v345_v54 = vpop.xlane.xlu0 %344 }
 0x36f   :  { %v348_v57 = vpop.xlane.xlu1 %347  ;;  %932 = vrcp.f32 %v345_v54 }
 0x370   :  { %934 = vrcp.f32 %v348_v57 }
 0x372   :  { %v929_v53 = vpop.eup %928 }
 0x373   :  { %v369_v55 = vmul.f32 %v929_v53, %v913_v19  ;;  %v354_v59 = vpop.xlane.xlu1 %353  ;;  %v606_v19 = vld [vmem:[%s1201_s3 + $0x10] sm:$0xff] }
 0x374   :  { %v893_v26 = vpack.c.bf16 %v607_v23, %v606_v19 }
 0x375   :  { %813 = vmatprep.mubr.msk.f32.mxu0 %vm288_vm2, %v369_v55 }
 0x376   :  { %v351_v56 = vpop.xlane.xlu0 %350  ;;  %v931_v0 = vpop.eup %930 }
 0x377   :  { %936 = vrcp.f32 %v351_v56  ;;  %v370_v2 = vmul.f32 %v931_v0, %v915_v27 }
 0x378   :  { %938 = vrcp.f32 %v354_v59 }
 0x379   :  { %v933_v1 = vpop.eup %932 }
 0x37a   :  { %v357_v58 = vpop.xlane.xlu0 %356  ;;  %v935_v3 = vpop.eup %934  ;;  %v371_v4 = vmul.f32 %v933_v1, %v919_v36 }
 0x37b   :  { %940 = vrcp.f32 %v357_v58  ;;  %v372_v6 = vmul.f32 %v935_v3, %v917_v35 }
 0x37e   :  { %v909_v60 = vpop.permute.xlu0 %908  ;;  %v360_v14 = vpop.xlane.xlu1 %359 }
 0x37f   :  { %v911_v61 = vunpack.i.h.bf16 %v909_v60  ;;  %v910_v62 = vunpack.i.l.bf16 %v909_v60  ;;  %942 = vrcp.f32 %v360_v14 }
 0x381   :  { %v869_v63 = vpack.c.bf16 %v911_v61, %v910_v62  ;;  %v937_v5 = vpop.eup %936 }
 0x382   :  { %v939_v7 = vpop.eup %938  ;;  %v373_v8 = vmul.f32 %v937_v5, %v923_v45 }
 0x383   :  { %870 = vmatprep.subr.bf16.mxu0 %v869_v63  ;;  %v374_v10 = vmul.f32 %v939_v7, %v921_v42 }
 0x384   :  { %872 = vmatpush3.bf16.msra.mxu0 %v869_v63 }
 0x385   :  { %v941_v9 = vpop.eup %940  ;;  %890 = vmatprep.subr.bf16.mxu0 %v889_v22 }
 0x386   :  { %v375_v13 = vmul.f32 %v941_v9, %v925_v47 }
 0x387   :  { %814 = vmatmul.mubr.msk.f32.vlgmr.msra.gmra.mrb[2].mxu0 %vm288_vm2, %v370_v2 }
 0x388   :  { %816 = vmatprep.mubr.msk.f32.mxu0 %vm288_vm2, %v371_v4  ;;  %892 = vmatpush3.bf16.msra.mxu0 %v889_v22 }
 0x389   :  { %v943_v11 = vpop.eup %942  ;;  %894 = vmatprep.subr.bf16.mxu0 %v893_v26 }
 0x38a   :  { %v376_v15 = vmul.f32 %v943_v11, %v927_v49 }
 0x38b   :  { %817 = vmatmul.mubr.msk.f32.gmra.mrb[4].mxu0 %vm288_vm2, %v372_v6 }
 0x38c   :  { %819 = vmatprep.mubr.msk.f32.mxu0 %vm288_vm2, %v373_v8  ;;  %896 = vmatpush3.bf16.msra.mxu0 %v893_v26 }
 0x38f   :  { %820 = vmatmul.mubr.msk.f32.gmra.mrb[6].mxu0 %vm288_vm2, %v374_v10 }
 0x390   :  { %822 = vmatprep.mubr.msk.f32.mxu0 %vm288_vm2, %v375_v13 }
 0x393   :  { %823 = vmatmul.mubr.msk.f32.gmra.mrb[8].mxu0 %vm288_vm2, %v376_v15 }
 0x45a   :  { %v815_v27 = vpop.f32.mrb[2].mxu0 }
 0x45b   :  { %v513_v30 = vmul.f32 %v815_v27, %v1056_v20  ;;  %v473_v31 = vpop.f32.mrb[3].mxu0 }
 0x45c   :  { %v512_v33 = vmul.f32 %v473_v31, %v1044_v12 }
 0x45e   :  { %v873_v34 = vpack.c.bf16 %v513_v30, %v512_v33  ;;  %v818_v35 = vpop.f32.mrb[4].mxu0 }
 0x45f   :  { %v515_v36 = vmul.f32 %v818_v35, %v1068_v24  ;;  %v483_v37 = vpop.f32.mrb[5].mxu0 }
 0x460   :  { %v514_v38 = vmul.f32 %v483_v37, %v1061_v21  ;;  %874 = vmatprep.subr.bf16.mxu1 %v873_v34 }
 0x461   :  { %876 = vmatpush3.bf16.msra.mxu1 %v873_v34 }
 0x462   :  { %v877_v39 = vpack.c.bf16 %v515_v36, %v514_v38  ;;  %v821_v40 = vpop.f32.mrb[6].mxu0 }
 0x463   :  { %v517_v41 = vmul.f32 %v821_v40, %v1082_v28  ;;  %v493_v42 = vpop.f32.mrb[7].mxu0  ;;  %v521_v28 = vld [vmem:[%s1205_s7 + $0x8] sm:$0xff]  ;;  %s944_s7 = scalar_lea.vmem %s704_s5, 256 }
 0x464   :  { %v516_v43 = vmul.f32 %v493_v42, %v1074_v25  ;;  %878 = vmatprep.subr.bf16.mxu1 %v877_v39  ;;  %p945_p0 = scmp.ne.s32.totalorder %s704_s5, %s944_s7  ;;  %p950_p2 = scmp.lt.s32.totalorder %s944_s7, %s944_s7 }
 0x465   :  { %880 = vmatpush3.bf16.msra.mxu1 %v877_v39 }
 0x466   :  { %v881_v20 = vpack.c.bf16 %v517_v41, %v516_v43  ;;  %v824_v12 = vpop.f32.mrb[8].mxu0  ;;  %p951_p3 = por %p950_p2, %p949_p1 }
 0x467   :  { %v519_v44 = vmul.f32 %v824_v12, %v1096_v32  ;;  %v503_v45 = vpop.f32.mrb[9].mxu0 }
 0x468   :  { %v518_v24 = vmul.f32 %v503_v45, %v1088_v29  ;;  %882 = vmatprep.subr.bf16.mxu1 %v881_v20  ;;  %v737_v29 = vld [vmem:[%s1202_s4] ss:$0 sm:$0xff]  ;;  %p952_p4 = pnand %p951_p3, %p945_p0 }
 0x469   :  { %884 = vmatpush3.bf16.msra.mxu1 %v881_v20 }
 0x46a   :  { %v885_v21 = vpack.c.bf16 %v519_v44, %v518_v24 }
 0x46c   :  { %886 = vmatprep.subr.bf16.mxu1 %v885_v21 }
 0x46d   :  { %888 = vmatpush3.bf16.msra.mxu1 %v885_v21 }
 0x470   :  { %842 = vmatmul.mubr.msk.f32.vlgmr.msra.gmra.mrb[8].mxu1 %vm522_vm3, %v521_v28 }
 0x543   :  { %v843_v25 = vpop.f32.mrb[8].mxu1 }
 0x544   :  { %v595_v46 = vpop.f32.mrb[9].mxu1 }
 0x545   :  { %852 = vmatprep.mubr.msk.f32.mxu0 %vm43_vm0, %v595_v46 }
 0x546   :  { %853 = vmatmul.mubr.msk.f32.vlgmr.msra.gmra.mrb[10].mxu0 %vm43_vm0, %v843_v25 }
 0x619   :  { %v854_v32 = vpop.f32.mrb[10].mxu0 }
 0x61a   :  { %v693_v47 = vadd.f32 %v854_v32, %v737_v29  ;;  %v687_v48 = vpop.f32.mrb[11].mxu0 }
 0x61b   :  { %v688_v49 = vadd.f32 %v737_v29, %v687_v48 }
 0x61c   :  { %697 = vst.msk [vmem:[#allocation2 + $0x8] sm:$0xff] %vm43_vm0, %v693_v47 }
 0x61d   :  { %696 = vst.msk [vmem:[#allocation2] sm:$0xff] %vm43_vm0, %v688_v49 }
 0x61e   :  { %955 = shalt.err (!%p952_p4)
}
 0x61f   :  { %s956_s16 = scalar_lea.hbm %s1206_s8, 256 }
 0x620   :  { %p957_p5 = scmp.ne.s32.totalorder %s1206_s8, %s956_s16  ;;  %p960_p6 = scmp.lt.u32.totalorder %s956_s16, %s1206_s8 }
 0x622   :  { %p962_p7 = pnand %p960_p6, %p957_p5 }
 0x624   :  { %965 = shalt.err (!%p962_p7)
}
 0x625   :  { %s971_s0 = smov 128   ;;  %s972_s2 = smov 8  }
 0x626   :  { %709 = dma.vmem_to_hbm [thread:$0]  %s704_s5, 256, %s1206_s8, [#allocation3], %s971_s0, %s971_s0, %s972_s2  }
 0x627   :  { %966 = dma.done.wait [#allocation3], 256  }
 0x628   :  { %967 = vsyncadd [#allocation3], 4294967040 }
 0x629   :  { %713 = vsyncpa [#allocation3], 1 }

</bundles_post_ra>
